<compile_context>
chip_gen: v5e
topology: v5e:2x2
jax: 0.10.0
libtpu: 0.0.40
codegen_flags: <defaults>
</compile_context>

<pallas_src>
import jax
import jax.numpy as jnp
from jax import lax
from jax.experimental import pallas as pl
from jax.experimental.pallas import tpu as pltpu


# ----------------------------------------------------------------------------
# helpers
# ----------------------------------------------------------------------------
def _pick_tile(B, cap):
    """Largest power-of-two tile <= cap that divides B and leaves >=2 grid
    steps (so v7x's second TensorCore gets work).  Falls back to one
    whole-batch tile for tiny / odd batches."""
    for tm in (4096, 2048, 1024, 512, 256, 128, 64, 32, 16, 8):
        if tm <= cap and B % tm == 0 and B // tm >= 2:
            return tm
    return B


def pack_params(params, matmul_dtype=jnp.float32):
    """One-time weight packing (do this OUTSIDE the solver hot loop).

    - splits W1 into the time row (w1t) and the x rows (w1x),
    - casts the matmul operands to `matmul_dtype`.  bf16 is MXU-native on
      v5e/v6e/v7x and packs 2 rows/sublane, halving resident-weight vreg
      pressure inside the fused Euler loop; biases / additive terms stay f32.
    """
    w1, b1, w2, b2 = params["w1"], params["b1"], params["w2"], params["b2"]
    D = w1.shape[0] - 1
    H = w1.shape[1]
    assert w2.shape == (H, D) and b1.shape == (H,) and b2.shape == (D,)

    w1t = w1[0:1, :].astype(jnp.float32)            # [1, H]
    w1x = w1[1:, :].astype(matmul_dtype)            # [D, H]
    w2c = w2.astype(matmul_dtype)                   # [H, D]
    b1r = b1.reshape(1, H).astype(jnp.float32)      # [1, H]
    b2r = b2.reshape(1, D).astype(jnp.float32)      # [1, D]
    return {"w1t": w1t, "w1x": w1x, "b1": b1r, "w2": w2c, "b2": b2r,
            "D": D, "H": H}


def _common_specs(tm, D, H):
    """BlockSpecs shared by both kernels: tiled x/out, resident weights
    (constant index_maps -> weights are DMA'd once and stay in VMEM)."""
    in_specs = [
        pl.BlockSpec((tm, D), lambda i: (i, 0)),   # x tile   (streamed)
        pl.BlockSpec((D, H), lambda i: (0, 0)),    # w1x      (resident)
        pl.BlockSpec((1, H), lambda i: (0, 0)),    # w1t      (resident)
        pl.BlockSpec((1, H), lambda i: (0, 0)),    # b1       (resident)
        pl.BlockSpec((H, D), lambda i: (0, 0)),    # w2       (resident)
        pl.BlockSpec((1, D), lambda i: (0, 0)),    # b2       (resident)
    ]
    out_spec = pl.BlockSpec((tm, D), lambda i: (i, 0))
    return in_specs, out_spec


_COMPILER_PARAMS = pltpu.CompilerParams(
    dimension_semantics=("parallel",),       # batch axis -> both TCs on v7x
    vmem_limit_bytes=32 * 1024 * 1024,
)


# ----------------------------------------------------------------------------
# kernels
# ----------------------------------------------------------------------------
def _net_apply(t, x, w1x, w1t, b1, w2, b2, mm_dtype):
    """net(concat([t, x])) with the concat folded into the first matmul.

    Matmuls run in `mm_dtype` (f32 or bf16) with f32 accumulation; the bias
    term tb = t*W1[0] + b1 is a single [1, H] vector (reassociated), the
    tanh and the adds stay f32."""
    tb = t * w1t + b1                                                         # [1, H]
    h = jnp.dot(x.astype(mm_dtype), w1x, preferred_element_type=jnp.float32)  # [tm, H]
    h = jnp.tanh(h + tb)
    o = jnp.dot(h.astype(mm_dtype), w2, preferred_element_type=jnp.float32)   # [tm, D]
    return o + b2


def odefunc_kernel(t_ref, x_ref, w1x_ref, w1t_ref, b1_ref, w2_ref, b2_ref, out_ref):
    """Single forward evaluation f(t, x) for one batch tile."""
    t = t_ref[0, 0]                                 # SMEM scalar
    o = _net_apply(t, x_ref[...],
                   w1x_ref[...], w1t_ref[...], b1_ref[...],
                   w2_ref[...], b2_ref[...], w1x_ref.dtype)
    out_ref[...] = o.astype(out_ref.dtype)


def odefunc_euler_kernel(ts_ref, x_ref, w1x_ref, w1t_ref, b1_ref, w2_ref, b2_ref,
                         out_ref):
    """Fused explicit-Euler integration over all timesteps for one batch tile.

    Weights live in VMEM/vregs for the whole integration; per-step times come
    from a small SMEM array; the f32 state is carried by fori_loop."""
    mm_dtype = w1x_ref.dtype
    w1x = w1x_ref[...]
    w1t = w1t_ref[...]
    b1 = b1_ref[...]
    w2 = w2_ref[...]
    b2 = b2_ref[...]
    n_steps = ts_ref.shape[0] - 1                   # static

    def body(k, x):
        t0 = ts_ref[k]                              # cheap SMEM scalar loads
        dt = ts_ref[k + 1] - t0
        return x + dt * _net_apply(t0, x, w1x, w1t, b1, w2, b2, mm_dtype)

    x_final = lax.fori_loop(0, n_steps, body, x_ref[...].astype(jnp.float32))
    out_ref[...] = x_final.astype(out_ref.dtype)


# ----------------------------------------------------------------------------
# wrappers
# ----------------------------------------------------------------------------
def odefunc_forward(t, x_t, packed):
    """ODEFunc.forward: t scalar, x_t [B, D] f32  ->  [B, D] f32."""
    B, D = x_t.shape
    H = packed["H"]
    assert D == packed["D"]
    tm = _pick_tile(B, cap=2048)                    # (tm, 16) f32 tile is tiny

    t_2d = jnp.asarray(t, jnp.float32).reshape(1, 1)
    in_specs, out_spec = _common_specs(tm, D, H)
    return pl.pallas_call(
        odefunc_kernel,
        out_shape=jax.ShapeDtypeStruct((B, D), jnp.float32),
        grid=(B // tm,),
        in_specs=[pl.BlockSpec(memory_space=pltpu.MemorySpace.SMEM)] + in_specs,
        out_specs=out_spec,
        compiler_params=_COMPILER_PARAMS,
    )(t_2d, x_t, packed["w1x"], packed["w1t"], packed["b1"],
      packed["w2"], packed["b2"])


def odefunc_integrate_euler(ts, x0, packed, donate_state=False):
    """Whole Euler integration x_{k+1} = x_k + dt_k * f(t_k, x_k) in ONE kernel.

    ts: [n_steps+1] f32 time grid, x0: [B, D] f32.  Returns x(ts[-1]) [B, D].
    Semantically identical to calling ODEFunc.forward once per step inside an
    Euler solver, but launch/DMA overhead is paid once.  With
    `donate_state=True` the state input is aliased to the output (no second
    [B, D] HBM buffer); only do this on the last use of x0."""
    B, D = x0.shape
    H = packed["H"]
    assert D == packed["D"]
    # Small tile: keep the f32 loop-carried state + h + resident weights in
    # the 64-vreg file (no per-step spill/reload), and leave >=2 grid steps.
    tm = _pick_tile(B, cap=128)

    ts = jnp.asarray(ts, jnp.float32)
    in_specs, out_spec = _common_specs(tm, D, H)
    return pl.pallas_call(
        odefunc_euler_kernel,
        out_shape=jax.ShapeDtypeStruct((B, D), jnp.float32),
        grid=(B // tm,),
        in_specs=[pl.BlockSpec(memory_space=pltpu.MemorySpace.SMEM)] + in_specs,
        out_specs=out_spec,
        input_output_aliases=({1: 0} if donate_state else {}),
        compiler_params=_COMPILER_PARAMS,
    )(ts, x0, packed["w1x"], packed["w1t"], packed["b1"],
      packed["w2"], packed["b2"])


# ----------------------------------------------------------------------------
# init + pure-JAX references
# ----------------------------------------------------------------------------
def init_params(key, D, H):
    """Matches PyTorch nn.Linear default init U(-1/sqrt(fan_in), 1/sqrt(fan_in))."""
    k1, k2, k3, k4 = jax.random.split(key, 4)
    bound1 = 1.0 / jnp.sqrt(D + 1.0)
    bound2 = 1.0 / jnp.sqrt(float(H))
    return {
        "w1": jax.random.uniform(k1, (D + 1, H), jnp.float32, -bound1, bound1),
        "b1": jax.random.uniform(k2, (H,), jnp.float32, -bound1, bound1),
        "w2": jax.random.uniform(k3, (H, D), jnp.float32, -bound2, bound2),
        "b2": jax.random.uniform(k4, (D,), jnp.float32, -bound2, bound2),
    }


def odefunc_forward_ref(t, x_t, params):
    B = x_t.shape[0]
    t_exp = jnp.broadcast_to(jnp.asarray(t, jnp.float32).reshape(1, 1), (B, 1))
    z = jnp.concatenate([t_exp, x_t], axis=-1)
    h = jnp.tanh(z @ params["w1"] + params["b1"])
    return h @ params["w2"] + params["b2"]


def euler_ref(ts, x0, params):
    x = x0
    for k in range(ts.shape[0] - 1):
        dt = ts[k + 1] - ts[k]
        x = x + dt * odefunc_forward_ref(ts[k], x, params)
    return x


# ----------------------------------------------------------------------------
# demo / self-test
# ----------------------------------------------------------------------------
if __name__ == "__main__":
    # B=16 so the batch grid has >=2 steps (engages both TCs on v7x).
    B, D, H = 16, 16, 32
    key = jax.random.PRNGKey(0)
    kx, kp = jax.random.split(key)
    x_t = jax.random.normal(kx, (B, D), jnp.float32)
    t = jnp.float32(0.3)
    params = init_params(kp, D, H)

    packed_f32 = pack_params(params, jnp.float32)    # exact-match path
    packed_bf16 = pack_params(params, jnp.bfloat16)  # MXU-native on v5e/v6e/v7x

    # 1) single forward, f32 matmuls (exact vs reference)
    ref = odefunc_forward_ref(t, x_t, params)
    out_f32 = jax.block_until_ready(odefunc_forward(t, x_t, packed_f32))
    assert out_f32.shape == (B, D)
    assert jnp.allclose(out_f32, ref, atol=1e-5, rtol=1e-5), "f32 forward mismatch"

    # 2) single forward, bf16 matmul inputs (f32 accumulate) — looser tolerance
    out_bf16 = jax.block_until_ready(odefunc_forward(t, x_t, packed_bf16))
    assert jnp.allclose(out_bf16, ref, atol=5e-2, rtol=5e-2), "bf16 forward mismatch"

    # 3) fused Euler integration (whole solver loop in one pallas_call)
    ts = jnp.linspace(0.0, 1.0, 9, dtype=jnp.float32)   # 8 Euler steps
    ref_T = euler_ref(ts, x_t, params)
    xT_f32 = jax.block_until_ready(odefunc_integrate_euler(ts, x_t, packed_f32))
    assert xT_f32.shape == (B, D)
    assert jnp.allclose(xT_f32, ref_T, atol=1e-4, rtol=1e-4), "f32 euler mismatch"

    # 4) fused Euler with bf16 matmul inputs; last use of x_t -> alias in/out.
    #    (bf16 rounding compounds over steps; keep f32 for long/stiff runs.)
    xT_bf16 = jax.block_until_ready(
        odefunc_integrate_euler(ts, x_t, packed_bf16, donate_state=True))
    assert jnp.allclose(xT_bf16, ref_T, atol=5e-2, rtol=5e-2), "bf16 euler mismatch"

    print("KERNEL_OK")
</pallas_src>

<mosaic_0001>
module attributes {stable_mosaic.version = 11 : i64} {
  func.func @odefunc_kernel(%arg0: i32, %arg1: memref<1x1xf32, #tpu.memory_space<smem>>, %arg2: memref<8x16xf32, #tpu.memory_space<vmem>>, %arg3: memref<16x32xf32, #tpu.memory_space<vmem>>, %arg4: memref<1x32xf32, #tpu.memory_space<vmem>>, %arg5: memref<1x32xf32, #tpu.memory_space<vmem>>, %arg6: memref<32x16xf32, #tpu.memory_space<vmem>>, %arg7: memref<1x16xf32, #tpu.memory_space<vmem>>, %arg8: memref<8x16xf32, #tpu.memory_space<vmem>>) attributes {dimension_semantics = [#tpu.dimension_semantics<parallel>], iteration_bounds = array<i64: 2>, scalar_prefetch = 0 : i64, scratch_operands = 0 : i64, tpu.core_type = #tpu.core_type<tc>, window_params = [{transform_indices = @transform_0, window_bounds = array<i64: 1, 1>}, {transform_indices = @transform_1, window_bounds = array<i64: 8, 16>}, {pipeline_mode = #tpu.pipeline_mode<synchronous>, transform_indices = @transform_2, window_bounds = array<i64: 16, 32>}, {pipeline_mode = #tpu.pipeline_mode<synchronous>, transform_indices = @transform_3, window_bounds = array<i64: 1, 32>}, {pipeline_mode = #tpu.pipeline_mode<synchronous>, transform_indices = @transform_4, window_bounds = array<i64: 1, 32>}, {pipeline_mode = #tpu.pipeline_mode<synchronous>, transform_indices = @transform_5, window_bounds = array<i64: 32, 16>}, {pipeline_mode = #tpu.pipeline_mode<synchronous>, transform_indices = @transform_6, window_bounds = array<i64: 1, 16>}, {transform_indices = @transform_7, window_bounds = array<i64: 8, 16>}]} {
    %c0 = arith.constant 0 : index
    %c0_0 = arith.constant 0 : index
    %0 = memref.load %arg1[%c0, %c0_0] : memref<1x1xf32, #tpu.memory_space<smem>>
    %c0_1 = arith.constant 0 : index
    %c0_2 = arith.constant 0 : index
    %1 = vector.load %arg2[%c0_1, %c0_2] : memref<8x16xf32, #tpu.memory_space<vmem>>, vector<8x16xf32>
    %c0_3 = arith.constant 0 : index
    %c0_4 = arith.constant 0 : index
    %2 = vector.load %arg3[%c0_3, %c0_4] : memref<16x32xf32, #tpu.memory_space<vmem>>, vector<16x32xf32>
    %c0_5 = arith.constant 0 : index
    %c0_6 = arith.constant 0 : index
    %3 = vector.load %arg4[%c0_5, %c0_6] : memref<1x32xf32, #tpu.memory_space<vmem>>, vector<1x32xf32>
    %c0_7 = arith.constant 0 : index
    %c0_8 = arith.constant 0 : index
    %4 = vector.load %arg5[%c0_7, %c0_8] : memref<1x32xf32, #tpu.memory_space<vmem>>, vector<1x32xf32>
    %c0_9 = arith.constant 0 : index
    %c0_10 = arith.constant 0 : index
    %5 = vector.load %arg6[%c0_9, %c0_10] : memref<32x16xf32, #tpu.memory_space<vmem>>, vector<32x16xf32>
    %c0_11 = arith.constant 0 : index
    %c0_12 = arith.constant 0 : index
    %6 = vector.load %arg7[%c0_11, %c0_12] : memref<1x16xf32, #tpu.memory_space<vmem>>, vector<1x16xf32>
    %7 = vector.broadcast %0 : f32 to vector<1x32xf32>
    %8 = arith.mulf %7, %3 : vector<1x32xf32>
    %9 = arith.addf %8, %4 : vector<1x32xf32>
    %cst = arith.constant dense<0.000000e+00> : vector<8x32xf32>
    %10 = tpu.matmul %1, %2, %cst {dimension_numbers = #tpu.dot_dimension_numbers<[1], [0], [0], [1], [0, 0, 1, 1], [], []>} : vector<8x16xf32>, vector<16x32xf32>, vector<8x32xf32> -> vector<8x32xf32>
    %11 = vector.broadcast %9 : vector<1x32xf32> to vector<8x32xf32>
    %12 = arith.addf %10, %11 : vector<8x32xf32>
    %13 = math.tanh %12 : vector<8x32xf32>
    %cst_13 = arith.constant dense<0.000000e+00> : vector<8x16xf32>
    %14 = tpu.matmul %13, %5, %cst_13 {dimension_numbers = #tpu.dot_dimension_numbers<[1], [0], [0], [1], [0, 0, 1, 1], [], []>} : vector<8x32xf32>, vector<32x16xf32>, vector<8x16xf32> -> vector<8x16xf32>
    %15 = vector.broadcast %6 : vector<1x16xf32> to vector<8x16xf32>
    %16 = arith.addf %14, %15 : vector<8x16xf32>
    %c0_14 = arith.constant 0 : index
    %c0_15 = arith.constant 0 : index
    %17 = vector.load %arg8[%c0_14, %c0_15] : memref<8x16xf32, #tpu.memory_space<vmem>>, vector<8x16xf32>
    tpu.vector_store %arg8[%c0_14, %c0_15], %16 {strides = array<i32>} : memref<8x16xf32, #tpu.memory_space<vmem>>, vector<8x16xf32>,
    return
  }
  func.func @transform_0(%arg0: i32) -> (i32, i32) {
    %c0_i32 = arith.constant 0 : i32
    %c0_i32_0 = arith.constant 0 : i32
    %c0_i32_1 = arith.constant 0 : i32
    return %c0_i32, %c0_i32_0 : i32, i32
  }
  func.func @transform_1(%arg0: i32) -> (i32, i32) {
    %c0_i32 = arith.constant 0 : i32
    %c0_i32_0 = arith.constant 0 : i32
    return %arg0, %c0_i32 : i32, i32
  }
  func.func @transform_2(%arg0: i32) -> (i32, i32) {
    %c0_i32 = arith.constant 0 : i32
    %c0_i32_0 = arith.constant 0 : i32
    %c0_i32_1 = arith.constant 0 : i32
    return %c0_i32, %c0_i32_0 : i32, i32
  }
  func.func @transform_3(%arg0: i32) -> (i32, i32) {
    %c0_i32 = arith.constant 0 : i32
    %c0_i32_0 = arith.constant 0 : i32
    %c0_i32_1 = arith.constant 0 : i32
    return %c0_i32, %c0_i32_0 : i32, i32
  }
  func.func @transform_4(%arg0: i32) -> (i32, i32) {
    %c0_i32 = arith.constant 0 : i32
    %c0_i32_0 = arith.constant 0 : i32
    %c0_i32_1 = arith.constant 0 : i32
    return %c0_i32, %c0_i32_0 : i32, i32
  }
  func.func @transform_5(%arg0: i32) -> (i32, i32) {
    %c0_i32 = arith.constant 0 : i32
    %c0_i32_0 = arith.constant 0 : i32
    %c0_i32_1 = arith.constant 0 : i32
    return %c0_i32, %c0_i32_0 : i32, i32
  }
  func.func @transform_6(%arg0: i32) -> (i32, i32) {
    %c0_i32 = arith.constant 0 : i32
    %c0_i32_0 = arith.constant 0 : i32
    %c0_i32_1 = arith.constant 0 : i32
    return %c0_i32, %c0_i32_0 : i32, i32
  }
  func.func @transform_7(%arg0: i32) -> (i32, i32) {
    %c0_i32 = arith.constant 0 : i32
    %c0_i32_0 = arith.constant 0 : i32
    return %arg0, %c0_i32 : i32, i32
  }
}

</mosaic_0001>

<bundles_post_ra>
// kernel: tpu_custom_call.1
= control target key start
LH: loop header
LB: loop body
LE: loop exit
PB: predicated region body
PF: predicated region fallthrough
CT: control target
= control target key end

     0   :  { %s695_s0 = inlined_call_operand.<no memory space> [shape: f32[1,1], index: 0, kind: input, shape index: {}]   ;;  %s696_s1 = inlined_call_operand.vmem [shape: f32[16,16], index: 1, kind: input, shape index: {}]   ;;  %s697_s2 = inlined_call_operand.vmem [shape: f32[16,32], index: 2, kind: input, shape index: {}]   ;;  %s698_s3 = inlined_call_operand.vmem [shape: f32[1,32], index: 3, kind: input, shape index: {}]   ;;  %s699_s4 = inlined_call_operand.vmem [shape: f32[1,32], index: 4, kind: input, shape index: {}]   ;;  %s700_s5 = inlined_call_operand.vmem [shape: f32[32,16], index: 5, kind: input, shape index: {}]   ;;  %s701_s6 = inlined_call_operand.vmem [shape: f32[1,16], index: 6, kind: input, shape index: {}]   ;;  %s702_s7 = inlined_call_operand.hbm [shape: f32[16,16], index: 7, kind: output, shape index: {}]  }
   0x1   :  { %12 = sst [smem:[#allocation2]] %s695_s0 }
   0x2   :  { %13 = vsyncpa [#allocation4], 0 }
   0x3   :  { %15 = vsyncpa [#allocation4 + $0x1], 0  ;;  %s581_s26 = smov 0   ;;  %s583_s27 = smov 0  }
   0x4   :  { %s585_s28 = smov 0   ;;  %s587_s29 = smov 0  }
   0x5 LB: > { %s602_s0 = sadd.s32 4294967295, %s536_s29   ;;  %s420_s30 = sadd.s32 4294967294, %s536_s29   ;;  %s536_s29 = sphi %s587_s29, %s708_s29   ;;  %s532_s28 = sphi %s585_s28, %s707_s28   ;;  %s528_s27 = sphi %s583_s27, %s706_s27   ;;  %s524_s26 = sphi %s581_s26, %s705_s26  }
   0x6   : > { %s606_s8 = sadd.s32 1, %s536_s29   ;;  %s180_s9 = sadd.s32 1, %s532_s28 }
   0x7   : > { %s177_s10 = ssub.s32 %s536_s29, %s606_s8  ;;  %p190_p0 = scmp.ne.s32.totalorder %s532_s28, %s528_s27 }
   0x8   : > { %p178_p1 = scmp.eq.s32.totalorder %s177_s10, 0  ;;  %p191_p2 = scmp.eq.s32.totalorder %s602_s0, 1 }
   0x9   : > { %p196_p3 = scmp.ne.s32.totalorder %s528_s27, %s524_s26  ;;  %p197_p4 = scmp.eq.s32.totalorder %s420_s30, 1 }
   0xa   : > { %s617_s11 = scalar_select %p178_p1, %s532_s28, %s180_s9  }
   0xb   : > { %p619_p5 = por %p191_p2, %p190_p0  ;;  %p623_p6 = por %p197_p4, %p196_p3 }
   0xc   : > { %p423_p7 = scmp.ge.s32.totalorder %s536_s29, 1  ;;  %p240_p8 = scmp.lt.s32.totalorder %s536_s29, 3 }
   0xe   : > { %p241_p9 = pnand %p423_p7, %p240_p8 }
   0xf   : > { %p271_p10 = scmp.lt.s32.totalorder (!%p241_p9), %s602_s0, 1  ;;  %s275_s16 = sld [smem:[#allocation2]] (!%p241_p9) }
  0x10   : > { %244 = sbr.rel (%p241_p9) target bundleno = 292 (0x124), region = 48  ;;  %s268_s21 = sand.u32 (!%p241_p9), 1, %s528_s27  }
  0x11   : > { %s429_s23 = sshll.u32 (!%p241_p9), %s602_s0, 3  ;;  %s346_s17 = scalar_lea.sflag (!%p241_p9), [#allocation4], %s268_s21 }
  0x12   : > { %s356_s30 = scalar_lea.hbm (!%p241_p9), %s702_s7, %s429_s23 }
  0x15   : > { %v278_v0 = vld [vmem:[%s697_s2 + $0x8] sm:$0xff]  ;;  %v277_v1 = vld [vmem:[%s697_s2] sm:$0xff]  ;;  %s272_s18 = scalar_select %p271_p10, %s602_s0, 1  ;;  %vm292_vm0 = vcmask 130048   ;;  %v284_v3 = vld [vmem:[%s700_s5 + $0x18] sm:$0xff]  ;;  %v286_v8 = vstv %s275_s16  ;;  %vm320_vm1 = vcmask 261120  }
  0x16   : > { %310 = vmatpush.msra.mxu0 %v278_v0  ;;  %336 = vmatpush.msra.mxu1 %v284_v3  ;;  %v283_v4 = vld [vmem:[%s700_s5 + $0x10] sm:$0xff]  ;;  %v282_v5 = vld [vmem:[%s700_s5 + $0x8] sm:$0xff]  ;;  %v281_v6 = vld [vmem:[%s700_s5] sm:$0xff]  ;;  %s360_s16 = sshll.u32 %s356_s30, 4  ;;  %s361_s16 = int_to_ptr.hbm [resolvable:$true] %s360_s16 }
  0x17   : > { %s425_s19 = sshll.u32 %s272_s18, 3  ;;  %v279_v7 = vld [vmem:[%s698_s3] sm:$0x1]  ;;  %s488_s0 = sshra.s32 %s361_s16, 4  ;;  %s489_s0 = int_to_ptr.hbm [resolvable:$true] %s488_s0 }
  0x18   : > { %311 = vmatpush.msra.mxu0 %v277_v1  ;;  %s274_s22 = scalar_lea.vmem %s696_s1, %s425_s19  ;;  %337 = vmatpush.msra.mxu1 %v283_v4  ;;  %v287_v9 = vmul.f32 %v286_v8, %v279_v7  ;;  %v280_v10 = vld [vmem:[%s699_s4] sm:$0x1]  ;;  %s490_s18 = scalar_lea.hbm %s489_s0, 8 }
  0x19   : > { %v276_v2 = vld [vmem:[%s274_s22] sm:$0xff]  ;;  %s424_s22 = sshll.u32 %s268_s21, 3  ;;  %p491_p11 = scmp.ne.s32.totalorder %s489_s0, %s490_s18 }
  0x1a   : > { %426 = vmatmul.msk.f32.vlgmr.msra.gmra.mxu0 %vm292_vm0, %v276_v2  ;;  %338 = vmatpush.msra.mxu1 %v282_v5  ;;  %v288_v11 = vadd.f32 %v287_v9, %v280_v10  ;;  %v471_v16 = vld [vmem:[%s701_s6] ss:$0 sm:$0xff]  ;;  %s270_s14 = scalar_lea.vmem [#allocation3], %s424_s22  ;;  %s494_s22 = scalar_lea.hbm %s702_s7, 16 }
  0x1b   : > { %s358_s15 = sshll.u32 %s270_s14, 4  ;;  %p492_p12 = pnand %p491_p11, %p619_p5  ;;  %s359_s15 = int_to_ptr.vmem [resolvable:$true] %s358_s15 }
  0x1c   : > { %339 = vmatpush.msra.mxu1 %v281_v6  ;;  %v290_v12 = vperm.slane %v288_v11, 0  ;;  %p495_p0 = scmp.lt.s32.totalorder %s489_s0, %s702_s7  ;;  %p496_p1 = scmp.lt.s32.totalorder %s494_s22, %s490_s18 }
  0x1d   : > { %p493_p13 = pneg %p492_p12 }
  0x1e   : > { %p497_p2 = por %p496_p1, %p495_p0 }
  0x20   : > { %p498_p3 = pnand %p497_p2, %p493_p13 }
  0x97   : > { %v313_v13 = vpop.f32.mrf.mxu0 }
  0x98   : > { %v314_v14 = vadd.f32 %v313_v13, %v290_v12 }
  0x9a   : > { %472 = vtanh.f32 %v314_v14 }
  0xa0   : > { %v473_v15 = vpop.eup %472 }
  0xa1   : > { %427 = vmatmul.msk.f32.vlgmr.msra.gmra.mxu1 %vm320_vm1, %v473_v15 }
 0x11e   : > { %v341_v17 = vpop.f32.mrf.mxu1 }
 0x11f   : > { %v342_v18 = vadd.f32 %v471_v16, %v341_v17 }
 0x121   : > { %344 = vst.msk [vmem:[%s270_s14] sm:$0xff] %vm292_vm0, %v342_v18 }
 0x122   : > { %501 = shalt.err (!%p498_p3)
}
 0x123   : > { %432 = dma.vmem_to_hbm [thread:$0]  (%p619_p5), %s359_s15, 128, %s361_s16, %s346_s17  }
 0x124 PF: > { %p438_p4 = scmp.ge.s32.totalorder %s536_s29, 2  ;;  %s372_s21 = sand.u32 1, %s524_s26  }
 0x125   : > { %s373_s25 = scalar_lea.sflag [#allocation4], %s372_s21 }
 0x126   : > { %p435_p7 = pnand %p438_p4, %p623_p6 }
 0x128   : > { %p436_p8 = pneg %p435_p7 }
 0x12a   : > { %519 = dma.done.wait (%p436_p8), %s373_s25, 128  }
 0x12b   : > { %521 = vsyncadd (%p436_p8), %s373_s25, 4294967168  ;;  %p18_p9 = scmp.ge.s32.totalorder %s606_s8, 4   ;;  %s705_s26 = smov %s528_s27 }
 0x12c   : > { %s706_s27 = smov %s532_s28  ;;  %s707_s28 = smov %s617_s11 }
 0x12d   : > { %s708_s29 = smov %s606_s8  ;;  %20 = sbr.rel (!%p18_p9) target bundleno = 5 (0x5), region = 83 }
 0x132   :  { %379 = vsyncpa [#allocation4], 1 }
 0x133   :  { %381 = vsyncpa [#allocation4 + $0x1], 1 }

</bundles_post_ra>
